<compile_context>
chip_gen: v7x
topology: tpu7x:2x2x1
jax: 0.10.0
libtpu: 0.0.40
codegen_flags: <defaults>
</compile_context>

<pallas_src>
import math

import jax
import jax.numpy as jnp
from jax import lax
from jax.experimental import pallas as pl
from jax.experimental.pallas import tpu as pltpu


# Below this size, XLA's native dynamic-slice beats any custom call.
_SMALL_ITEM_BYTES = 256 * 1024
# Above this size, split the copy into chunks (multi-DMA / megacore sharding).
_MULTI_DMA_BYTES = 4 * 1024 * 1024


def _single_dma_kernel(idx_ref, x_ref, o_ref, sem):
    """Copy x_ref[idx] (HBM) -> o_ref (HBM) with one direct DMA."""
    idx = idx_ref[0]  # runtime index from SMEM (scalar prefetch)
    cp = pltpu.make_async_copy(x_ref.at[idx], o_ref, sem)
    cp.start()
    cp.wait()


def _make_chunked_dma_kernel(chunk_rows):
    """Grid point i copies rows [i*chunk_rows, (i+1)*chunk_rows) of the item."""

    def kernel(idx_ref, x_ref, o_ref, sem):
        idx = idx_ref[0]
        i = pl.program_id(0)
        row0 = pl.multiple_of(i * chunk_rows, chunk_rows)
        cp = pltpu.make_async_copy(
            x_ref.at[idx, pl.ds(row0, chunk_rows)],
            o_ref.at[pl.ds(row0, chunk_rows)],
            sem,
        )
        cp.start()
        cp.wait()

    return kernel


def select_item(inputs: jax.Array, item_index, *, force_pallas: bool = False,
                n_chunks: int | None = None) -> jax.Array:
    """Pallas equivalent of `inputs[item_index]` (selection along axis 0)."""
    if inputs.ndim < 1:
        raise ValueError("select_item needs at least a 1-D input")

    N = inputs.shape[0]
    out_shape = inputs.shape[1:]
    item_elems = math.prod(out_shape) if out_shape else 1
    item_bytes = item_elems * jnp.dtype(inputs.dtype).itemsize

    # Runtime scalar index: wrap negatives (PyTorch semantics) and clamp so a
    # bad index can never cause an out-of-bounds DMA (hard device fault).
    idx = jnp.asarray(item_index, dtype=jnp.int32)
    idx = jnp.where(idx < 0, idx + N, idx)
    idx = jnp.clip(idx, 0, N - 1)

    # Tiny items: native dynamic-slice is strictly faster than a custom call.
    if not force_pallas and item_bytes < _SMALL_ITEM_BYTES:
        sel = lax.dynamic_slice_in_dim(inputs, idx, 1, axis=0)
        return sel.reshape(out_shape)

    # Decide how many DMA chunks to use (shards across TCs on v7x).
    if n_chunks is None:
        n_chunks = 1
        if item_bytes >= _MULTI_DMA_BYTES and len(out_shape) >= 1:
            for c in (8, 4, 2):
                if out_shape[0] % c == 0:
                    n_chunks = c
                    break
    if len(out_shape) == 0 or n_chunks <= 1 or out_shape[0] % n_chunks != 0:
        n_chunks = 1

    if n_chunks == 1:
        kernel = _single_dma_kernel
        semantics = ("arbitrary",)
    else:
        kernel = _make_chunked_dma_kernel(out_shape[0] // n_chunks)
        semantics = ("parallel",)

    grid_spec = pltpu.PrefetchScalarGridSpec(
        num_scalar_prefetch=1,
        grid=(n_chunks,),
        in_specs=[pl.BlockSpec(memory_space=pl.ANY)],   # raw HBM ref (no auto-DMA)
        out_specs=pl.BlockSpec(memory_space=pl.ANY),    # raw HBM ref (we DMA into it)
        scratch_shapes=[pltpu.SemaphoreType.DMA(())],
    )

    return pl.pallas_call(
        kernel,
        out_shape=jax.ShapeDtypeStruct(out_shape, inputs.dtype),
        grid_spec=grid_spec,
        compiler_params=pltpu.CompilerParams(
            dimension_semantics=semantics,
        ),
        cost_estimate=pl.CostEstimate(
            flops=0,
            transcendentals=0,
            bytes_accessed=2 * item_bytes,   # read item + write item
        ),
    )(idx.reshape((1,)), inputs)


if __name__ == "__main__":
    key = jax.random.PRNGKey(0)
    # Small shapes: N=3 stacked items, batch=8, hidden=128 (lane-aligned).
    N, B, H = 3, 8, 128
    x = jax.random.normal(key, (N, B, H), dtype=jnp.float32)

    # Auto dispatch: tiny item -> native dynamic-slice fast path.
    out_auto = jax.block_until_ready(select_item(x, 1))
    assert out_auto.shape == x[1].shape and out_auto.dtype == x[1].dtype
    assert jnp.array_equal(out_auto, x[1])

    # Force the Pallas single-DMA path (validates the kernel on-device).
    out_p1 = jax.block_until_ready(select_item(x, 1, force_pallas=True))
    assert out_p1.shape == x[1].shape and out_p1.dtype == x[1].dtype
    assert jnp.array_equal(out_p1, x[1])

    # Force the chunked (multi-DMA, megacore-shardable) path.
    out_p2 = jax.block_until_ready(
        select_item(x, 2, force_pallas=True, n_chunks=2))
    assert jnp.array_equal(out_p2, x[2])

    # Negative index (PyTorch semantics); reuses the same compiled kernel
    # since the index is a runtime scalar-prefetch value.
    out_neg = jax.block_until_ready(select_item(x, -1, force_pallas=True))
    assert jnp.array_equal(out_neg, x[N - 1])

    print("KERNEL_OK")
</pallas_src>

<mosaic_0001>
module attributes {stable_mosaic.version = 11 : i64} {
  func.func @_single_dma_kernel(%arg0: i32, %arg1: memref<1xi32, #tpu.memory_space<smem>>, %arg2: memref<3x8x128xf32, #tpu.memory_space<any>>, %arg3: memref<8x128xf32, #tpu.memory_space<any>>, %arg4: memref<!tpu.dma_semaphore, #tpu.memory_space<semaphore_mem>>) attributes {dimension_semantics = [#tpu.dimension_semantics<arbitrary>], iteration_bounds = array<i64: 1>, scalar_prefetch = 1 : i64, scratch_operands = 1 : i64, tpu.core_type = #tpu.core_type<tc>, window_params = [{}, {}]} {
    %c0 = arith.constant 0 : index
    %0 = memref.load %arg1[%c0] : memref<1xi32, #tpu.memory_space<smem>>
    %c0_i32 = arith.constant 0 : i32
    %c0_i32_0 = arith.constant 0 : i32
    %1 = tpu.memref_slice %arg2[%0, %c0_i32, %c0_i32_0] : memref<3x8x128xf32, #tpu.memory_space<any>> -> memref<1x8x128xf32, #tpu.memory_space<any>>
    %2 = tpu.memref_squeeze %1 : memref<1x8x128xf32, #tpu.memory_space<any>> -> memref<8x128xf32, #tpu.memory_space<any>>
    tpu.enqueue_dma source(%2 : memref<8x128xf32, #tpu.memory_space<any>>) target(%arg3 : memref<8x128xf32, #tpu.memory_space<any>>) target_semaphore(%arg4 : memref<!tpu.dma_semaphore, #tpu.memory_space<semaphore_mem>>)
    %c0_i32_1 = arith.constant 0 : i32
    %c0_i32_2 = arith.constant 0 : i32
    %3 = tpu.memref_slice %arg2[%0, %c0_i32_1, %c0_i32_2] : memref<3x8x128xf32, #tpu.memory_space<any>> -> memref<1x8x128xf32, #tpu.memory_space<any>>
    %4 = tpu.memref_squeeze %3 : memref<1x8x128xf32, #tpu.memory_space<any>> -> memref<8x128xf32, #tpu.memory_space<any>>
    tpu.wait_dma2 semaphore(%arg4 : memref<!tpu.dma_semaphore, #tpu.memory_space<semaphore_mem>>) src(%4 : memref<8x128xf32, #tpu.memory_space<any>>) dst(%arg3 : memref<8x128xf32, #tpu.memory_space<any>>)
    return
  }
}

</mosaic_0001>

<bundles_post_ra>
// kernel: tpu_custom_call.1
= control target key start
LH: loop header
LB: loop body
LE: loop exit
PB: predicated region body
PF: predicated region fallthrough
CT: control target
= control target key end

     0   :  { %s45_s15 = smov [#allocation2]   ;;  %s46_s16 = smov [#allocation5]   ;;  %s72_s0 = inlined_call_operand.<no memory space> [shape: s32[1], index: 0, kind: input, shape index: {}]   ;;  %s73_s1 = inlined_call_operand.hbm [shape: f32[3,8,128], index: 1, kind: input, shape index: {}]   ;;  %s74_s2 = inlined_call_operand.hbm [shape: f32[8,128], index: 2, kind: output, shape index: {}]  }
   0x1   :  { %s39_s11 = sshll.u32 %s72_s0, 7  ;;  %s47_s17 = smov 0  }
   0x2   :  { %s11_s14 = scalar_lea.hbm %s73_s1, %s39_s11 }
   0x3   :  { %24 = dma.general %s11_s14, 128, %s74_s2, %s45_s15, %s46_s16, [#allocation6], %s47_s17, 0  }
   0x4   :  { %43 = dma.done.wait [#allocation2], 128 }
   0x5   :  { %44 = vsyncadd [#allocation2], 4294967168 }
   0x6   :  { %28 = vsyncmov [#allocation2] }
   0x9   :  { %s29_s20 = vpop.sfrf %28 }
   0xa   :  { %p38_p0 = scmp.ne.s32.totalorder %s29_s20, 0 }
   0xc   :  { %33 = shalt.err (%p38_p0)  }

</bundles_post_ra>
